<compile_context>
chip_gen: v7x
topology: tpu7x:2x2x1
jax: 0.10.0
libtpu: 0.0.40
codegen_flags: <defaults>
</compile_context>

<pallas_src>
import functools

import jax
import jax.numpy as jnp
from jax.experimental import pallas as pl
from jax.experimental.pallas import tpu as pltpu

_LN_EPS = 1e-5  # PyTorch nn.LayerNorm default


def _ffn_kernel(x_ref, gamma_ref, beta_ref, w1_ref, b1_ref, w2_ref, b2_ref,
                o_ref, y_ref, acc_ref, *, eps, use_layernorm):
    """Grid = (row tiles, ff chunks).  Per step: acc += relu(y@W1_k+b1_k)@W2_k."""
    k = pl.program_id(1)
    nk = pl.num_programs(1)

    # ---- per-row-tile init (k == 0): LayerNorm once, zero the accumulator --
    @pl.when(k == 0)
    def _init():
        # NOTE: if m % bm != 0 the padded edge rows hold unspecified data; they
        # are row-independent and their stores are masked, so valid rows are
        # unaffected even if rsqrt produces NaN/Inf there.
        x = x_ref[...].astype(jnp.float32)
        if use_layernorm:
            mean = jnp.mean(x, axis=-1, keepdims=True)
            xc = x - mean
            var = jnp.mean(xc * xc, axis=-1, keepdims=True)
            y = xc * jax.lax.rsqrt(var + eps)
            y = y * gamma_ref[...] + beta_ref[...]
        else:
            y = x
        y_ref[...] = y.astype(y_ref.dtype)          # single bf16 copy for MXU
        acc_ref[...] = jnp.zeros_like(acc_ref)

    # ---- one ff chunk: Linear1 + ReLU (f32 epilogue), Linear2 accumulate ---
    h = jnp.dot(y_ref[...], w1_ref[...], preferred_element_type=jnp.float32)
    h = jnp.maximum(h + b1_ref[...], 0.0).astype(w2_ref.dtype)   # bf16 for MXU
    acc_ref[...] += jnp.dot(h, w2_ref[...], preferred_element_type=jnp.float32)

    # ---- finalize (last k): bias2 + residual, lane-dense store --------------
    @pl.when(k == nk - 1)
    def _finalize():
        out = acc_ref[...] + b2_ref[...] + x_ref[...].astype(jnp.float32)
        o_ref[...] = out.astype(o_ref.dtype)


def transformer_ff(x, params, *, eps=_LN_EPS, use_layernorm=True,
                   block_rows=256, block_ff=512):
    """x: [..., res_dim] -> same shape.  params = (gamma, beta, w1, b1, w2, b2)."""
    gamma, beta, w1, b1, w2, b2 = params
    res_dim = x.shape[-1]
    ff_dim = w1.shape[1]

    orig_shape = x.shape
    x2 = x.reshape(-1, res_dim)        # free, contiguous reshape (no transpose)
    m = x2.shape[0]

    # Row tile: 256 fills the MXU M dim and amortizes grid-step overhead.
    bm = min(block_rows, m)
    # ff tile: bound resident weights; fall back to full ff if it doesn't divide.
    if ff_dim > block_ff and ff_dim % block_ff == 0:
        tk = block_ff
    else:
        tk = ff_dim

    grid = (pl.cdiv(m, bm), ff_dim // tk)

    const = lambda shape: pl.BlockSpec(shape, lambda i, k: (0,) * len(shape))

    itemsize = lambda a: a.size * a.dtype.itemsize
    cost = pl.CostEstimate(
        flops=4 * m * res_dim * ff_dim,            # two GEMMs
        transcendentals=m,                         # one rsqrt per row
        bytes_accessed=(2 * itemsize(x2) + itemsize(w1) + itemsize(w2)
                        + itemsize(b1) + itemsize(b2)
                        + itemsize(gamma) + itemsize(beta)),
    )

    out2 = pl.pallas_call(
        functools.partial(_ffn_kernel, eps=eps, use_layernorm=use_layernorm),
        out_shape=jax.ShapeDtypeStruct((m, res_dim), x.dtype),
        grid=grid,
        in_specs=[
            pl.BlockSpec((bm, res_dim), lambda i, k: (i, 0)),   # x row tile
            const((1, res_dim)),                                # gamma
            const((1, res_dim)),                                # beta
            pl.BlockSpec((res_dim, tk), lambda i, k: (0, k)),   # W1 chunk (bf16)
            pl.BlockSpec((1, tk), lambda i, k: (0, k)),         # b1 chunk
            pl.BlockSpec((tk, res_dim), lambda i, k: (k, 0)),   # W2 chunk (bf16)
            const((1, res_dim)),                                # b2
        ],
        out_specs=pl.BlockSpec((bm, res_dim), lambda i, k: (i, 0)),
        scratch_shapes=[
            pltpu.VMEM((bm, res_dim), jnp.bfloat16),   # y (LN output, MXU operand)
            pltpu.VMEM((bm, res_dim), jnp.float32),    # f32 accumulator
        ],
        compiler_params=pltpu.CompilerParams(
            dimension_semantics=("parallel", "arbitrary"),
            vmem_limit_bytes=64 * 1024 * 1024),
        cost_estimate=cost,
    )(x2, gamma, beta, w1, b1, w2, b2)

    return out2.reshape(orig_shape)


def make_params(key, res_dim, ff_dim):
    """Synthetic init matching the module's parameter shapes (weights in bf16)."""
    k1, k2, kg, kb = jax.random.split(key, 4)
    gamma = 1.0 + 0.01 * jax.random.normal(kg, (1, res_dim), jnp.float32)
    beta = 0.01 * jax.random.normal(kb, (1, res_dim), jnp.float32)
    w1 = (0.05 * jax.random.normal(k1, (res_dim, ff_dim), jnp.float32)
          ).astype(jnp.bfloat16)
    b1 = jnp.zeros((1, ff_dim), jnp.float32)
    w2 = (0.05 * jax.random.normal(k2, (ff_dim, res_dim), jnp.float32)
          ).astype(jnp.bfloat16)
    b2 = jnp.zeros((1, res_dim), jnp.float32)
    return (gamma, beta, w1, b1, w2, b2)


def _reference(x, params, eps=_LN_EPS):
    """Pure-JAX f32 reference of the PyTorch forward (dropout = identity)."""
    gamma, beta, w1, b1, w2, b2 = params
    xf = x.astype(jnp.float32)
    mean = jnp.mean(xf, axis=-1, keepdims=True)
    var = jnp.mean((xf - mean) ** 2, axis=-1, keepdims=True)
    y = (xf - mean) * jax.lax.rsqrt(var + eps) * gamma + beta
    h = jnp.maximum(y @ w1.astype(jnp.float32) + b1, 0.0)
    return (h @ w2.astype(jnp.float32) + b2 + xf).astype(x.dtype)


if __name__ == "__main__":
    # Small shapes consistent with the module: [seq, batch, res_dim], ff_dim.
    seq, batch, res_dim, ff_dim = 8, 2, 128, 512

    key = jax.random.PRNGKey(0)
    kx, kp = jax.random.split(key)
    x = jax.random.normal(kx, (seq, batch, res_dim), jnp.float32)
    params = make_params(kp, res_dim, ff_dim)

    # Small tiles here purely so the demo exercises BOTH grid axes
    # (2 row tiles x 2 ff chunks); production defaults are 256 / 512.
    out = transformer_ff(x, params, block_rows=8, block_ff=256)
    out = jax.block_until_ready(out)

    assert out.shape == x.shape
    ref = _reference(x, params)
    err = float(jnp.max(jnp.abs(out - ref)))
    # bf16 MXU operands vs f32 reference -> small rounding differences.
    assert err < 2e-2, err

    print("KERNEL_OK")
</pallas_src>

<mosaic_0001>
module attributes {stable_mosaic.version = 11 : i64} {
  func.func @_ffn_kernel(%arg0: i32, %arg1: i32, %arg2: memref<8x128xf32, #tpu.memory_space<vmem>>, %arg3: memref<1x128xf32, #tpu.memory_space<vmem>>, %arg4: memref<1x128xf32, #tpu.memory_space<vmem>>, %arg5: memref<128x256xbf16, #tpu.memory_space<vmem>>, %arg6: memref<1x256xf32, #tpu.memory_space<vmem>>, %arg7: memref<256x128xbf16, #tpu.memory_space<vmem>>, %arg8: memref<1x128xf32, #tpu.memory_space<vmem>>, %arg9: memref<8x128xf32, #tpu.memory_space<vmem>>, %arg10: memref<8x128xbf16, #tpu.memory_space<vmem>>, %arg11: memref<8x128xf32, #tpu.memory_space<vmem>>) attributes {dimension_semantics = [#tpu.dimension_semantics<parallel>, #tpu.dimension_semantics<arbitrary>], iteration_bounds = array<i64: 2, 2>, scalar_prefetch = 0 : i64, scratch_operands = 2 : i64, tpu.core_type = #tpu.core_type<tc>, window_params = [{transform_indices = @transform_0, window_bounds = array<i64: 8, 128>}, {pipeline_mode = #tpu.pipeline_mode<synchronous>, transform_indices = @transform_1, window_bounds = array<i64: 1, 128>}, {pipeline_mode = #tpu.pipeline_mode<synchronous>, transform_indices = @transform_2, window_bounds = array<i64: 1, 128>}, {transform_indices = @transform_3, window_bounds = array<i64: 128, 256>}, {transform_indices = @transform_4, window_bounds = array<i64: 1, 256>}, {transform_indices = @transform_5, window_bounds = array<i64: 256, 128>}, {pipeline_mode = #tpu.pipeline_mode<synchronous>, transform_indices = @transform_6, window_bounds = array<i64: 1, 128>}, {transform_indices = @transform_7, window_bounds = array<i64: 8, 128>}]} {
    %c0_i32 = arith.constant 0 : i32
    %0 = arith.cmpi eq, %arg1, %c0_i32 : i32
    %1 = arith.extui %0 : i1 to i32
    %c0_i32_0 = arith.constant 0 : i32
    %2 = arith.cmpi ne, %1, %c0_i32_0 : i32
    scf.if %2 {
      %c0_15 = arith.constant 0 : index
      %c0_16 = arith.constant 0 : index
      %20 = vector.load %arg2[%c0_15, %c0_16] : memref<8x128xf32, #tpu.memory_space<vmem>>, vector<8x128xf32>
      %cst_17 = arith.constant dense<0.000000e+00> : vector<8xf32>
      %21 = vector.multi_reduction <add>, %20, %cst_17 [1] : vector<8x128xf32> to vector<8xf32>
      %22 = vector.shape_cast %21 : vector<8xf32> to vector<8x1xf32>
      %cst_18 = arith.constant 1.280000e+02 : f32
      %23 = vector.broadcast %cst_18 : f32 to vector<8x1xf32>
      %24 = arith.divf %22, %23 : vector<8x1xf32>
      %25 = vector.broadcast %24 : vector<8x1xf32> to vector<8x128xf32>
      %26 = arith.subf %20, %25 : vector<8x128xf32>
      %27 = arith.mulf %26, %26 : vector<8x128xf32>
      %cst_19 = arith.constant dense<0.000000e+00> : vector<8xf32>
      %28 = vector.multi_reduction <add>, %27, %cst_19 [1] : vector<8x128xf32> to vector<8xf32>
      %29 = vector.shape_cast %28 : vector<8xf32> to vector<8x1xf32>
      %cst_20 = arith.constant 1.280000e+02 : f32
      %30 = vector.broadcast %cst_20 : f32 to vector<8x1xf32>
      %31 = arith.divf %29, %30 : vector<8x1xf32>
      %cst_21 = arith.constant 9.99999974E-6 : f32
      %32 = vector.broadcast %cst_21 : f32 to vector<8x1xf32>
      %33 = arith.addf %31, %32 : vector<8x1xf32>
      %34 = math.rsqrt %33 : vector<8x1xf32>
      %35 = vector.broadcast %34 : vector<8x1xf32> to vector<8x128xf32>
      %36 = arith.mulf %26, %35 : vector<8x128xf32>
      %c0_22 = arith.constant 0 : index
      %c0_23 = arith.constant 0 : index
      %37 = vector.load %arg3[%c0_22, %c0_23] : memref<1x128xf32, #tpu.memory_space<vmem>>, vector<1x128xf32>
      %38 = vector.broadcast %37 : vector<1x128xf32> to vector<8x128xf32>
      %39 = arith.mulf %36, %38 : vector<8x128xf32>
      %c0_24 = arith.constant 0 : index
      %c0_25 = arith.constant 0 : index
      %40 = vector.load %arg4[%c0_24, %c0_25] : memref<1x128xf32, #tpu.memory_space<vmem>>, vector<1x128xf32>
      %41 = vector.broadcast %40 : vector<1x128xf32> to vector<8x128xf32>
      %42 = arith.addf %39, %41 : vector<8x128xf32>
      %43 = arith.truncf %42 : vector<8x128xf32> to vector<8x128xbf16>
      %c0_26 = arith.constant 0 : index
      %c0_27 = arith.constant 0 : index
      %44 = vector.load %arg10[%c0_26, %c0_27] : memref<8x128xbf16, #tpu.memory_space<vmem>>, vector<8x128xbf16>
      tpu.vector_store %arg10[%c0_26, %c0_27], %43 {strides = array<i32>} : memref<8x128xbf16, #tpu.memory_space<vmem>>, vector<8x128xbf16>,
      %cst_28 = arith.constant 0.000000e+00 : f32
      %45 = vector.broadcast %cst_28 : f32 to vector<8x128xf32>
      %c0_29 = arith.constant 0 : index
      %c0_30 = arith.constant 0 : index
      %46 = vector.load %arg11[%c0_29, %c0_30] : memref<8x128xf32, #tpu.memory_space<vmem>>, vector<8x128xf32>
      tpu.vector_store %arg11[%c0_29, %c0_30], %45 {strides = array<i32>} : memref<8x128xf32, #tpu.memory_space<vmem>>, vector<8x128xf32>,
    } else {
    }
    %c0 = arith.constant 0 : index
    %c0_1 = arith.constant 0 : index
    %3 = vector.load %arg10[%c0, %c0_1] : memref<8x128xbf16, #tpu.memory_space<vmem>>, vector<8x128xbf16>
    %c0_2 = arith.constant 0 : index
    %c0_3 = arith.constant 0 : index
    %4 = vector.load %arg5[%c0_2, %c0_3] : memref<128x256xbf16, #tpu.memory_space<vmem>>, vector<128x256xbf16>
    %cst = arith.constant dense<0.000000e+00> : vector<8x256xf32>
    %5 = tpu.matmul %3, %4, %cst {dimension_numbers = #tpu.dot_dimension_numbers<[1], [0], [0], [1], [0, 0, 1, 1], [], []>} : vector<8x128xbf16>, vector<128x256xbf16>, vector<8x256xf32> -> vector<8x256xf32>
    %c0_4 = arith.constant 0 : index
    %c0_5 = arith.constant 0 : index
    %6 = vector.load %arg6[%c0_4, %c0_5] : memref<1x256xf32, #tpu.memory_space<vmem>>, vector<1x256xf32>
    %7 = vector.broadcast %6 : vector<1x256xf32> to vector<8x256xf32>
    %8 = arith.addf %5, %7 : vector<8x256xf32>
    %cst_6 = arith.constant 0.000000e+00 : f32
    %9 = vector.broadcast %cst_6 : f32 to vector<8x256xf32>
    %10 = arith.maximumf %8, %9 : vector<8x256xf32>
    %11 = arith.truncf %10 : vector<8x256xf32> to vector<8x256xbf16>
    %c0_7 = arith.constant 0 : index
    %c0_8 = arith.constant 0 : index
    %12 = vector.load %arg11[%c0_7, %c0_8] : memref<8x128xf32, #tpu.memory_space<vmem>>, vector<8x128xf32>
    %c0_9 = arith.constant 0 : index
    %c0_10 = arith.constant 0 : index
    %13 = vector.load %arg7[%c0_9, %c0_10] : memref<256x128xbf16, #tpu.memory_space<vmem>>, vector<256x128xbf16>
    %cst_11 = arith.constant dense<0.000000e+00> : vector<8x128xf32>
    %14 = tpu.matmul %11, %13, %cst_11 {dimension_numbers = #tpu.dot_dimension_numbers<[1], [0], [0], [1], [0, 0, 1, 1], [], []>} : vector<8x256xbf16>, vector<256x128xbf16>, vector<8x128xf32> -> vector<8x128xf32>
    %15 = arith.addf %12, %14 : vector<8x128xf32>
    %c0_12 = arith.constant 0 : index
    %c0_13 = arith.constant 0 : index
    %16 = vector.load %arg11[%c0_12, %c0_13] : memref<8x128xf32, #tpu.memory_space<vmem>>, vector<8x128xf32>
    tpu.vector_store %arg11[%c0_12, %c0_13], %15 {strides = array<i32>} : memref<8x128xf32, #tpu.memory_space<vmem>>, vector<8x128xf32>,
    %c1_i32 = arith.constant 1 : i32
    %17 = arith.cmpi eq, %arg1, %c1_i32 : i32
    %18 = arith.extui %17 : i1 to i32
    %c0_i32_14 = arith.constant 0 : i32
    %19 = arith.cmpi ne, %18, %c0_i32_14 : i32
    scf.if %19 {
      %c0_15 = arith.constant 0 : index
      %c0_16 = arith.constant 0 : index
      %20 = vector.load %arg11[%c0_15, %c0_16] : memref<8x128xf32, #tpu.memory_space<vmem>>, vector<8x128xf32>
      %c0_17 = arith.constant 0 : index
      %c0_18 = arith.constant 0 : index
      %21 = vector.load %arg8[%c0_17, %c0_18] : memref<1x128xf32, #tpu.memory_space<vmem>>, vector<1x128xf32>
      %22 = vector.broadcast %21 : vector<1x128xf32> to vector<8x128xf32>
      %23 = arith.addf %20, %22 : vector<8x128xf32>
      %c0_19 = arith.constant 0 : index
      %c0_20 = arith.constant 0 : index
      %24 = vector.load %arg2[%c0_19, %c0_20] : memref<8x128xf32, #tpu.memory_space<vmem>>, vector<8x128xf32>
      %25 = arith.addf %23, %24 : vector<8x128xf32>
      %c0_21 = arith.constant 0 : index
      %c0_22 = arith.constant 0 : index
      %26 = vector.load %arg9[%c0_21, %c0_22] : memref<8x128xf32, #tpu.memory_space<vmem>>, vector<8x128xf32>
      tpu.vector_store %arg9[%c0_21, %c0_22], %25 {strides = array<i32>} : memref<8x128xf32, #tpu.memory_space<vmem>>, vector<8x128xf32>,
    } else {
    }
    return
  }
  func.func @transform_0(%arg0: i32, %arg1: i32) -> (i32, i32) {
    %c0_i32 = arith.constant 0 : i32
    %c0_i32_0 = arith.constant 0 : i32
    return %arg0, %c0_i32 : i32, i32
  }
  func.func @transform_1(%arg0: i32, %arg1: i32) -> (i32, i32) {
    %c0_i32 = arith.constant 0 : i32
    %c0_i32_0 = arith.constant 0 : i32
    %c0_i32_1 = arith.constant 0 : i32
    return %c0_i32, %c0_i32_0 : i32, i32
  }
  func.func @transform_2(%arg0: i32, %arg1: i32) -> (i32, i32) {
    %c0_i32 = arith.constant 0 : i32
    %c0_i32_0 = arith.constant 0 : i32
    %c0_i32_1 = arith.constant 0 : i32
    return %c0_i32, %c0_i32_0 : i32, i32
  }
  func.func @transform_3(%arg0: i32, %arg1: i32) -> (i32, i32) {
    %c0_i32 = arith.constant 0 : i32
    %c0_i32_0 = arith.constant 0 : i32
    return %c0_i32, %arg1 : i32, i32
  }
  func.func @transform_4(%arg0: i32, %arg1: i32) -> (i32, i32) {
    %c0_i32 = arith.constant 0 : i32
    %c0_i32_0 = arith.constant 0 : i32
    return %c0_i32, %arg1 : i32, i32
  }
  func.func @transform_5(%arg0: i32, %arg1: i32) -> (i32, i32) {
    %c0_i32 = arith.constant 0 : i32
    %c0_i32_0 = arith.constant 0 : i32
    return %arg1, %c0_i32 : i32, i32
  }
  func.func @transform_6(%arg0: i32, %arg1: i32) -> (i32, i32) {
    %c0_i32 = arith.constant 0 : i32
    %c0_i32_0 = arith.constant 0 : i32
    %c0_i32_1 = arith.constant 0 : i32
    return %c0_i32, %c0_i32_0 : i32, i32
  }
  func.func @transform_7(%arg0: i32, %arg1: i32) -> (i32, i32) {
    %c0_i32 = arith.constant 0 : i32
    %c0_i32_0 = arith.constant 0 : i32
    return %arg0, %c0_i32 : i32, i32
  }
}

</mosaic_0001>

<bundles_post_ra>
// kernel: tpu_custom_call.1
= control target key start
LH: loop header
LB: loop body
LE: loop exit
PB: predicated region body
PF: predicated region fallthrough
CT: control target
= control target key end

     0   :  { %s2221_s0 = inlined_call_operand.hbm [shape: f32[16,128], index: 0, kind: input, shape index: {}]   ;;  %s2222_s1 = inlined_call_operand.hbm [shape: f32[1,128], index: 1, kind: input, shape index: {}]   ;;  %s2223_s2 = inlined_call_operand.hbm [shape: f32[1,128], index: 2, kind: input, shape index: {}]   ;;  %s2224_s3 = inlined_call_operand.hbm [shape: bf16[128,512], index: 3, kind: input, shape index: {}]   ;;  %s2225_s4 = inlined_call_operand.hbm [shape: f32[1,512], index: 4, kind: input, shape index: {}]   ;;  %s2226_s5 = inlined_call_operand.hbm [shape: bf16[512,128], index: 5, kind: input, shape index: {}]   ;;  %s2227_s6 = inlined_call_operand.hbm [shape: f32[1,128], index: 6, kind: input, shape index: {}]   ;;  %s2228_s7 = inlined_call_operand.hbm [shape: f32[16,128], index: 7, kind: output, shape index: {}]  }
   0x1   :  { %2253 = sst [smem:[#allocation33_spill]] %s2221_s0 }
   0x2   :  { %2254 = sst [smem:[#allocation34_spill]] %s2222_s1 }
   0x3   :  { %2255 = sst [smem:[#allocation35_spill]] %s2223_s2 }
   0x4   :  { %2256 = sst [smem:[#allocation36_spill]] %s2224_s3 }
   0x5   :  { %2257 = sst [smem:[#allocation37_spill]] %s2226_s5 }
   0x6   :  { %2258 = sst [smem:[#allocation38_spill]] %s2227_s6 }
   0x7   :  { %2259 = sst [smem:[#allocation39_spill]] %s2228_s7 }
   0x8   :  { %12 = vsyncpa [#allocation5], 0 }
   0x9   :  { %14 = vsyncpa [#allocation5 + $0x1], 0 }
   0xa   :  { %15 = vsyncpa [#allocation8], 0 }
   0xb   :  { %16 = vsyncpa [#allocation11], 0 }
   0xc   :  { %18 = vsyncpa [#allocation11 + $0x1], 0 }
   0xd   :  { %19 = vsyncpa [#allocation14], 0 }
   0xe   :  { %21 = vsyncpa [#allocation14 + $0x1], 0 }
   0xf   :  { %22 = vsyncpa [#allocation6], 0 }
  0x10   :  { %24 = vsyncpa [#allocation6 + $0x1], 0  ;;  %s1717_s24 = smov 0   ;;  %s1719_s25 = smov 0  }
  0x11   :  { %s1721_s26 = smov 0   ;;  %s1723_s27 = smov 0  }
  0x12   :  { %s1725_s28 = smov 0   ;;  %s1727_s29 = smov 0  }
  0x13   :  { %s1729_s30 = smov 0   ;;  %s1731_s8 = smov 0  }
  0x14   :  { %s1733_s9 = smov 0   ;;  %s1735_s10 = smov 0  }
  0x15   :  { %s1737_s11 = smov 0  }
  0x16 LB: > { %2260 = sst [smem:[#allocation23_spill]] %s1624_s25  ;;  %s1771_s12 = sadd.s32 4294967295, %s1660_s11   ;;  %s1660_s11 = sphi %s1737_s11, %s30_s11   ;;  %s1656_s10 = sphi %s1735_s10, %s2318_s10   ;;  %s1652_s9 = sphi %s1733_s9, %s2324_s9   ;;  %s1648_s8 = sphi %s1731_s8, %s2316_s8   ;;  %s1644_s30 = sphi %s1729_s30, %s2323_s30   ;;  %s1640_s29 = sphi %s1727_s29, %s2315_s29   ;;  %s1636_s28 = sphi %s1725_s28, %s2322_s28   ;;  %s1632_s27 = sphi %s1723_s27, %s2321_s27   ;;  %s1628_s26 = sphi %s1721_s26, %s2320_s26   ;;  %s1624_s25 = sphi %s1719_s25, %s2319_s25   ;;  %s1620_s24 = sphi %s1717_s24, %s2313_s24  }
  0x17   : > { %2261 = sst [smem:[#allocation24_spill]] %s1640_s29  ;;  %p130_p0 = scmp.ne.s32.totalorder %s1624_s25, %s1620_s24 }
  0x18   : > { %2262 = sst [smem:[#allocation25_spill]] %s1644_s30  ;;  %p2230_p1 = scmp.eq.s32.totalorder %s1771_s12, 0 }
  0x19   : > { %2263 = sst [smem:[#allocation26_spill]] %s1648_s8  ;;  %p1030_p2 = scmp.ge.s32.totalorder %s1660_s11, 1 }
  0x1a   : > { %2264 = sst [smem:[#allocation27_spill]] %s1656_s10  ;;  %p240_p3 = scmp.lt.s32.totalorder %s1660_s11, 5 }
  0x1b   : > { %p1779_p4 = por %p130_p0, %p2230_p1  ;;  %s1662_s15 = smov [#allocation7]  }
  0x1c   : > { %p1783_p5 = pnand %p1030_p2, %p240_p3  ;;  %s253_s16 = sshll.u32 %s1662_s15, 4  ;;  %s254_s16 = int_to_ptr.vmem [resolvable:$true] %s253_s16 }
  0x1d   : > { %s2265_s13 = scalar_select %p1779_p4, 1, 0 }
  0x1e   : > { %s2267_s14 = scalar_select %p1783_p5, 1, 0 }
  0x1f   : > { %2266 = sst [smem:[#allocation28_spill]] %s2265_s13  ;;  %p1143_p6 = pneg %p1783_p5 }
  0x20   : > { %2268 = sst [smem:[#allocation29_spill]] %s2267_s14  ;;  %s1663_s17 = smov [#allocation15]  }
  0x21   : > { %s275_s18 = sshll.u32 %s1663_s17, 4  ;;  %p1791_p7 = pnand %p1143_p6, %p2230_p1  ;;  %s1795_s18 = int_to_ptr.vmem [resolvable:$true] %s275_s18 }
  0x22   : > { %s2270_s1 = sld [smem:[#allocation34_spill]] }
  0x23   : > { %s2269_s19 = scalar_select %p1791_p7, 1, 0 }
  0x24   : > { %p1805_p9 = pneg %p1791_p7 }
  0x26   : > { %s2271_s15 = scalar_select %p1805_p9, 1, 0 }
  0x28   : > { %s1318_s22 = scalar_lea.hbm %s2270_s1, 16 }
  0x29   : > { %p1319_p8 = scmp.ne.s32.totalorder %s2270_s1, %s1318_s22  ;;  %p1325_p12 = scmp.lt.u32.totalorder %s1318_s22, %s2270_s1 }
  0x2b   : > { %p1321_p10 = pnand %p1805_p9, %p1319_p8 }
  0x2d   : > { %p1322_p11 = pneg %p1321_p10 }
  0x2f   : > { %p1327_p13 = pnand %p1325_p12, %p1322_p11 }
  0x31   : > { %1330 = shalt.err (!%p1327_p13)
}
  0x32   : > { %s1331_s20 = scalar_lea.vmem %s254_s16, 16  ;;  %s1338_s21 = scalar_lea.vmem %s254_s16, 32 }
  0x33   : > { %p1332_p0 = scmp.ne.s32.totalorder %s254_s16, %s1331_s20  ;;  %p1339_p6 = scmp.lt.s32.totalorder %s254_s16, %s254_s16 }
  0x34   : > { %p1340_p1 = scmp.lt.s32.totalorder %s1338_s21, %s1331_s20 }
  0x35   : > { %p1334_p2 = pnand %p1332_p0, %p1805_p9 }
  0x36   : > { %p1341_p4 = por %p1340_p1, %p1339_p6 }
  0x37   : > { %p1335_p3 = pneg %p1334_p2 }
  0x39   : > { %p1342_p5 = pnand %p1341_p4, %p1335_p3 }
  0x3b   : > { %1345 = shalt.err (!%p1342_p5)
}
  0x3c   : > { %1146 = dma.hbm_to_vmem [thread:$0]  (!%p1791_p7), %s2270_s1, 16, %s254_s16, [#allocation8]  }
  0x3d   : > { %s2272_s6 = sld [smem:[#allocation38_spill]] }
  0x43   : > { %s1346_s17 = scalar_lea.hbm %s2272_s6, 16 }
  0x44   : > { %p1347_p8 = scmp.ne.s32.totalorder %s2272_s6, %s1346_s17  ;;  %p1353_p4 = scmp.lt.u32.totalorder %s1346_s17, %s2272_s6 }
  0x46   : > { %p1349_p10 = pnand %p1347_p8, %p1805_p9 }
  0x48   : > { %p1350_p1 = pneg %p1349_p10 }
  0x4a   : > { %p1355_p5 = pnand %p1353_p4, %p1350_p1 }
  0x4c   : > { %1358 = shalt.err (!%p1355_p5)
}
  0x4d   : > { %s1359_s16 = scalar_lea.vmem %s1795_s18, 16  ;;  %s1366_s30 = scalar_lea.vmem %s1795_s18, 32 }
  0x4e   : > { %p1360_p11 = scmp.ne.s32.totalorder %s1795_s18, %s1359_s16  ;;  %p1367_p0 = scmp.lt.s32.totalorder %s1795_s18, %s1795_s18 }
  0x4f   : > { %p1368_p2 = scmp.lt.s32.totalorder %s1366_s30, %s1359_s16 }
  0x50   : > { %p1362_p12 = pnand %p1360_p11, %p1805_p9 }
  0x51   : > { %p1369_p3 = por %p1368_p2, %p1367_p0 }
  0x52   : > { %p1363_p13 = pneg %p1362_p12 }
  0x54   : > { %p1370_p6 = pnand %p1369_p3, %p1363_p13 }
  0x56   : > { %1373 = shalt.err (!%p1370_p6)
}
  0x57   : > { %1152 = dma.hbm_to_vmem [thread:$0]  (!%p1791_p7), %s2272_s6, 16, %s1795_s18, [#allocation14]  }
  0x58   : > { %p2236_p8 = scmp.eq.s32.totalorder %s1660_s11, 0  ;;  %p124_p10 = scmp.ne.s32.totalorder %s1628_s26, %s1624_s25 }
  0x59   : > { %p2234_p1 = scmp.lt.s32.totalorder %s1660_s11, 4  ;;  %s2235_s7 = sand.u32 1, %s1660_s11  }
  0x5a   : > { %s2233_s22 = sand.u32 1, %s1628_s26   ;;  %p126_p4 = por %p124_p10, %p2236_p8 }
  0x5b   : > { %s1856_s17 = sshll.u32 %s2233_s22, 7  ;;  %s1096_s20 = sshll.u32 %s1652_s9, 7 }
  0x5c   : > { %s2273_s3 = sld [smem:[#allocation36_spill]]  ;;  %s308_s18 = scalar_lea.vmem [#allocation10], %s1856_s17 }
  0x5d   : > { %s315_s8 = sshll.u32 %s308_s18, 4  ;;  %p1867_p5 = pnand %p2234_p1, %p126_p4  ;;  %s1871_s8 = int_to_ptr.vmem [resolvable:$true] %s315_s8 }
  0x5e   : > { %s1875_s22 = scalar_lea.sflag [#allocation11], %s2235_s7 }
  0x5f   : > { %s2274_s23 = scalar_select %p1867_p5, 1, 0 }
  0x60   : > { %p1881_p12 = pneg %p1867_p5 }
  0x62   : > { %s1862_s30 = scalar_lea.hbm %s2273_s3, %s1096_s20  ;;  %s1379_s24 = scalar_lea.hbm %s2273_s3, 4096 }
  0x63   : > { %s1374_s21 = scalar_lea.hbm %s1862_s30, 2048  ;;  %p1380_p2 = scmp.lt.u32.totalorder %s1862_s30, %s2273_s3 }
  0x64   : > { %p1375_p11 = scmp.ne.s32.totalorder %s1862_s30, %s1374_s21  ;;  %p1381_p3 = scmp.lt.u32.totalorder %s1379_s24, %s1374_s21 }
  0x65   : > { %p1383_p10 = scmp.lt.u32.totalorder %s1374_s21, %s1862_s30 }
  0x66   : > { %p1377_p13 = pnand %p1881_p12, %p1375_p11  ;;  %p1382_p6 = por %p1381_p3, %p1380_p2 }
  0x68   : > { %p1378_p0 = pneg %p1377_p13  ;;  %p1384_p4 = por %p1383_p10, %p1382_p6 }
  0x6a   : > { %p1385_p1 = pnand %p1384_p4, %p1378_p0 }
  0x6c   : > { %1388 = shalt.err (!%p1385_p1)
}
  0x6d   : > { %s1389_s7 = scalar_lea.vmem %s1871_s8, 2048  ;;  %s1664_s16 = smov [#allocation10]  }
  0x6e   : > { %p1390_p11 = scmp.ne.s32.totalorder %s1871_s8, %s1389_s7  ;;  %s1394_s18 = sshll.u32 %s1664_s16, 4  ;;  %s1395_s18 = int_to_ptr.vmem [resolvable:$false] %s1394_s18 }
  0x6f   : > { %s1396_s1 = scalar_lea.vmem %s1395_s18, 4096  ;;  %p1397_p7 = scmp.lt.s32.totalorder %s1871_s8, %s1395_s18 }
  0x70   : > { %p1392_p13 = pnand %p1390_p11, %p1881_p12  ;;  %p1398_p9 = scmp.lt.s32.totalorder %s1396_s1, %s1389_s7 }
  0x72   : > { %p1393_p8 = pneg %p1392_p13  ;;  %p1399_p2 = por %p1398_p9, %p1397_p7 }
  0x74   : > { %p1400_p3 = pnand %p1399_p2, %p1393_p8 }
  0x76   : > { %1403 = shalt.err (!%p1400_p3)
}
  0x77   : > { %s1665_s6 = smov 256   ;;  %s1666_s24 = smov 128  }
  0x78   : > { %s1667_s21 = smov 8   ;;  %s1668_s3 = smov [#allocation9]  }
  0x79   : > { %1159 = dma.hbm_to_vmem [thread:$0]  (!%p1867_p5), %s1862_s30, 2048, %s1871_s8, %s1875_s22, %s1665_s6, %s1666_s24, %s1667_s21  }
  0x7a   : > { %s264_s13 = sshll.u32 %s1668_s3, 4  ;;  %s2276_s2 = sld [smem:[#allocation35_spill]]  ;;  %s265_s13 = int_to_ptr.vmem [resolvable:$true] %s264_s13 }
  0x7b   : > { %p2277_p9 = scmp.ne.s32.totalorder %s2271_s15, 0 }
  0x80   : > { %s1404_s7 = scalar_lea.hbm %s2276_s2, 16 }
  0x81   : > { %p1405_p7 = scmp.ne.s32.totalorder %s2276_s2, %s1404_s7  ;;  %p1411_p0 = scmp.lt.u32.totalorder %s1404_s7, %s2276_s2 }
  0x83   : > { %p1407_p8 = pnand %p1405_p7, %p2277_p9 }
  0x85   : > { %p1408_p1 = pneg %p1407_p8 }
  0x87   : > { %p1413_p6 = pnand %p1411_p0, %p1408_p1 }
  0x89   : > { %1416 = shalt.err (!%p1413_p6)
}
  0x8a   : > { %s1417_s30 = scalar_lea.vmem %s265_s13, 16  ;;  %s1424_s3 = scalar_lea.vmem %s265_s13, 32 }
  0x8b   : > { %p1418_p10 = scmp.ne.s32.totalorder %s265_s13, %s1417_s30  ;;  %p1425_p13 = scmp.lt.s32.totalorder %s265_s13, %s265_s13 }
  0x8c   : > { %p1426_p2 = scmp.lt.s32.totalorder %s1424_s3, %s1417_s30 }
  0x8d   : > { %p1420_p4 = pnand %p1418_p10, %p2277_p9 }
  0x8e   : > { %p1427_p3 = por %p1426_p2, %p1425_p13 }
  0x8f   : > { %p1421_p11 = pneg %p1420_p4 }
  0x91   : > { %p1428_p5 = pnand %p1427_p3, %p1421_p11 }
  0x93   : > { %1431 = shalt.err (!%p1428_p5)
}
  0x94   : > { %p2278_p7 = scmp.ne.s32.totalorder %s2269_s19, 0  ;;  %s1029_s5 = sadd.s32 4294967294, %s1660_s11  }
  0x95   : > { %s39_s14 = sadd.s32 1, %s1652_s9  ;;  %s42_s19 = sadd.s32 1, %s1656_s10 }
  0x96   : > { %1149 = dma.hbm_to_vmem [thread:$0]  (!%p2278_p7), %s2276_s2, 16, %s265_s13, [#allocation8]  }
  0x97   : > { %p40_p5 = scmp.ge.s32.totalorder %s39_s14, 2  ;;  %s49_s15 = sadd.s32 1, %s1640_s29 }
  0x98   : > { %p56_p9 = scmp.ne.s32.totalorder %s1640_s29, %s1636_s28  ;;  %p2280_p8 = scmp.eq.s32.totalorder %s1660_s11, 0 }
  0x99   : > { %s2326_s14 = smov (%p40_p5, %s39_s14), 0  ;;  %s2328_s19 = smov (!%p40_p5, %s42_s19), %s1656_s10 }
  0x9a   : > { %2279 = sst [smem:[#allocation30_spill]] %s2326_s14  ;;  %p1937_p1 = por %p2280_p8, %p56_p9 }
  0x9b   : > { %p62_p0 = scmp.ne.s32.totalorder %s1636_s28, %s1632_s27  ;;  %p44_p6 = scmp.ge.s32.totalorder %s2328_s19, 2 }
  0x9c   : > { %s114_s6 = ssub.s32 %s1652_s9, %s2326_s14  ;;  %p2282_p10 = scmp.eq.s32.totalorder %s1771_s12, 0 }
  0x9d   : > { %p115_p11 = scmp.eq.s32.totalorder %s114_s6, 0  ;;  %s2330_s19 = smov (%p44_p6, %s2328_s19), 0 }
  0x9e   : > { %p1950_p4 = por %p2282_p10, %p62_p0  ;;  %2284 = sst [smem:[#allocation31_spill]] %s2330_s19 }
  0x9f   : > { %s2285_s21 = sadd.s32 1, %s1628_s26  ;;  %s46_s7 = ssub.s32 %s1656_s10, %s2330_s19 }
  0xa0   : > { %s2283_s24 = scalar_select %p1950_p4, 1, 0 }
  0xa1   : > { %s1959_s16 = scalar_select %p115_p11, %s1628_s26, %s2285_s21  }
  0xa2   : > { %p227_p13 = scmp.eq.s32.totalorder %s1771_s12, 3  ;;  %p47_p2 = scmp.eq.s32.totalorder %s46_s7, 0 }
  0xa3   : > { %p233_p3 = scmp.eq.s32.totalorder %s1029_s5, 3  ;;  %s286_s1 = sand.u32 1, %s1640_s29  }
  0xa4   : > { %p1967_p7 = por %p227_p13, %p56_p9  ;;  %s1035_s25 = sshll.u32 %s286_s1, 3 }
  0xa5   : > { %s1973_s30 = scalar_select %p47_p2, %s1640_s29, %s49_s15  }
  0xa6   : > { %s2286_s18 = scalar_select %p1967_p7, 1, 0 }
  0xa7   : > { %2287 = sst [smem:[#allocation32_spill]] %s1973_s30  ;;  %p1978_p5 = por %p233_p3, %p62_p0 }
  0xa8   : > { %s1036_s8 = sshll.u32 %s1656_s10, 7  ;;  %s2289_s0 = sld [smem:[#allocation33_spill]] }
  0xa9   : > { %s2288_s3 = scalar_select %p1978_p5, 1, 0 }
  0xaa   : > { %s290_s5 = scalar_lea.vmem [#allocation4], %s1035_s25  ;;  %p2290_p9 = scmp.lt.s32.totalorder %s1660_s11, 4 }
  0xab   : > { %s297_s2 = sshll.u32 %s290_s5, 4  ;;  %s2292_s19 = sand.u32 1, %s1628_s26   ;;  %s1996_s2 = int_to_ptr.vmem [resolvable:$true] %s297_s2 }
  0xac   : > { %p1992_p8 = pnand %p2290_p9, %p1937_p1  ;;  %s2000_s6 = sshll.u32 %s2292_s19, 1 }
  0xae   : > { %s1986_s7 = scalar_lea.hbm %s2289_s0, %s1036_s8  ;;  %s287_s8 = scalar_lea.sflag [#allocation5], %s286_s1 }
  0xaf   : > { %s1432_s21 = scalar_lea.hbm %s1986_s7, 128  ;;  %p1434_p6 = pneg %p1992_p8 }
  0xb0   : > { %p1433_p0 = scmp.ne.s32.totalorder %s1986_s7, %s1432_s21  ;;  %s1437_s5 = scalar_lea.hbm %s2289_s0, 256 }
  0xb1   : > { %p1438_p1 = scmp.lt.u32.totalorder %s1986_s7, %s2289_s0  ;;  %p1439_p13 = scmp.lt.u32.totalorder %s1437_s5, %s1432_s21 }
  0xb2   : > { %p1435_p10 = pnand %p1434_p6, %p1433_p0  ;;  %p1441_p3 = scmp.lt.u32.totalorder %s1432_s21, %s1986_s7 }
  0xb3   : > { %p1440_p2 = por %p1439_p13, %p1438_p1 }
  0xb4   : > { %p1436_p11 = pneg %p1435_p10 }
  0xb5   : > { %p1442_p9 = por %p1441_p3, %p1440_p2 }
  0xb7   : > { %p1443_p5 = pnand %p1442_p9, %p1436_p11 }
  0xb9   : > { %1446 = shalt.err (!%p1443_p5)
}
  0xba   : > { %s1447_s19 = scalar_lea.vmem %s1996_s2, 128  ;;  %s1669_s1 = smov [#allocation4]  }
  0xbb   : > { %p1448_p0 = scmp.ne.s32.totalorder %s1996_s2, %s1447_s19  ;;  %s1452_s13 = sshll.u32 %s1669_s1, 4  ;;  %s1453_s13 = int_to_ptr.vmem [resolvable:$false] %s1452_s13 }
  0xbc   : > { %s1454_s10 = scalar_lea.vmem %s1453_s13, 256  ;;  %p1455_p4 = scmp.lt.s32.totalorder %s1996_s2, %s1453_s13 }
  0xbd   : > { %p1450_p10 = pnand %p1448_p0, %p1434_p6  ;;  %p1456_p1 = scmp.lt.s32.totalorder %s1454_s10, %s1447_s19 }
  0xbf   : > { %p1451_p7 = pneg %p1450_p10  ;;  %p1457_p13 = por %p1456_p1, %p1455_p4 }
  0xc1   : > { %p1458_p2 = pnand %p1457_p13, %p1451_p7 }
  0xc3   : > { %1461 = shalt.err (!%p1458_p2)
}
  0xc4   : > { %1156 = dma.hbm_to_vmem [thread:$0]  (!%p1992_p8), %s1986_s7, 128, %s1996_s2, %s287_s8  }
  0xc5   : > { %s1097_s14 = sshll.u32 %s1652_s9, 5  ;;  %s329_s21 = scalar_lea.vmem [#allocation12], %s2000_s6 }
  0xc6   : > { %s337_s25 = sshll.u32 %s329_s21, 4  ;;  %s335_s0 = scalar_lea.hbm %s2225_s4, %s1097_s14  ;;  %s338_s25 = int_to_ptr.vmem [resolvable:$true] %s337_s25 }
  0xc7   : > { %s1462_s19 = scalar_lea.hbm %s335_s0, 32  ;;  %s1467_s10 = scalar_lea.hbm %s2225_s4, 64 }
  0xc8   : > { %p1463_p4 = scmp.ne.s32.totalorder %s335_s0, %s1462_s19  ;;  %p1468_p8 = scmp.lt.u32.totalorder %s335_s0, %s2225_s4 }
  0xc9   : > { %p1469_p6 = scmp.lt.u32.totalorder %s1467_s10, %s1462_s19  ;;  %p1471_p3 = scmp.lt.u32.totalorder %s1462_s19, %s335_s0 }
  0xca   : > { %p1465_p7 = pnand %p1463_p4, %p1881_p12 }
  0xcb   : > { %p1470_p11 = por %p1469_p6, %p1468_p8 }
  0xcc   : > { %p1466_p5 = pneg %p1465_p7 }
  0xcd   : > { %p1472_p9 = por %p1471_p3, %p1470_p11 }
  0xcf   : > { %p1473_p0 = pnand %p1472_p9, %p1466_p5 }
  0xd1   : > { %1476 = shalt.err (!%p1473_p0)
}
  0xd2   : > { %s1477_s2 = scalar_lea.vmem %s338_s25, 32  ;;  %s1670_s7 = smov [#allocation12]  }
  0xd3   : > { %p1478_p10 = scmp.ne.s32.totalorder %s338_s25, %s1477_s2  ;;  %s1482_s6 = sshll.u32 %s1670_s7, 4  ;;  %s1483_s6 = int_to_ptr.vmem [resolvable:$false] %s1482_s6 }
  0xd4   : > { %s1484_s8 = scalar_lea.vmem %s1483_s6, 64  ;;  %p1485_p2 = scmp.lt.s32.totalorder %s338_s25, %s1483_s6 }
  0xd5   : > { %p1480_p1 = pnand %p1478_p10, %p1881_p12  ;;  %p1486_p4 = scmp.lt.s32.totalorder %s1484_s8, %s1477_s2 }
  0xd7   : > { %p1481_p13 = pneg %p1480_p1  ;;  %p1487_p7 = por %p1486_p4, %p1485_p2 }
  0xd9   : > { %p1488_p6 = pnand %p1487_p7, %p1481_p13 }
  0xdb   : > { %1491 = shalt.err (!%p1488_p6)
}
  0xdc   : > { %p2293_p8 = scmp.ne.s32.totalorder %s2274_s23, 0  ;;  %s1098_s29 = sshll.u32 %s1652_s9, 11 }
  0xdd   : > { %s348_s30 = scalar_lea.vmem [#allocation13], %s1856_s17  ;;  %s2294_s1 = sld [smem:[#allocation37_spill]] }
  0xde   : > { %1162 = dma.hbm_to_vmem [thread:$0]  (!%p2293_p8), %s335_s0, 32, %s338_s25, %s1875_s22  }
  0xdf   : > { %s355_s14 = sshll.u32 %s348_s30, 4  ;;  %s2295_s15 = sand.u32 1, %s1660_s11   ;;  %s2052_s14 = int_to_ptr.vmem [resolvable:$true] %s355_s14 }
  0xe0   : > { %s2056_s13 = scalar_lea.sflag [#allocation14], %s2295_s15 }
  0xe3   : > { %s2050_s19 = scalar_lea.hbm %s2294_s1, %s1098_s29  ;;  %s1497_s17 = scalar_lea.hbm %s2294_s1, 4096 }
  0xe4   : > { %s1492_s10 = scalar_lea.hbm %s2050_s19, 2048  ;;  %p1498_p9 = scmp.lt.u32.totalorder %s2050_s19, %s2294_s1 }
  0xe5   : > { %p1493_p5 = scmp.ne.s32.totalorder %s2050_s19, %s1492_s10  ;;  %p1499_p0 = scmp.lt.u32.totalorder %s1497_s17, %s1492_s10 }
  0xe6   : > { %p1501_p1 = scmp.lt.u32.totalorder %s1492_s10, %s2050_s19 }
  0xe7   : > { %p1495_p11 = pnand %p1493_p5, %p1881_p12  ;;  %p1500_p10 = por %p1499_p0, %p1498_p9 }
  0xe9   : > { %p1496_p3 = pneg %p1495_p11  ;;  %p1502_p13 = por %p1501_p1, %p1500_p10 }
  0xeb   : > { %p1503_p2 = pnand %p1502_p13, %p1496_p3 }
  0xed   : > { %1506 = shalt.err (!%p1503_p2)
}
  0xee   : > { %s1507_s7 = scalar_lea.vmem %s2052_s14, 2048  ;;  %s1671_s6 = smov [#allocation13]  }
  0xef   : > { %p1508_p4 = scmp.ne.s32.totalorder %s2052_s14, %s1507_s7  ;;  %s1512_s8 = sshll.u32 %s1671_s6, 4  ;;  %s1513_s8 = int_to_ptr.vmem [resolvable:$false] %s1512_s8 }
  0xf0   : > { %s1514_s29 = scalar_lea.vmem %s1513_s8, 4096  ;;  %p1515_p5 = scmp.lt.s32.totalorder %s2052_s14, %s1513_s8 }
  0xf1   : > { %p1510_p7 = pnand %p1508_p4, %p1881_p12  ;;  %p1516_p11 = scmp.lt.s32.totalorder %s1514_s29, %s1507_s7 }
  0xf3   : > { %p1511_p6 = pneg %p1510_p7  ;;  %p1517_p9 = por %p1516_p11, %p1515_p5 }
  0xf5   : > { %p1518_p0 = pnand %p1517_p9, %p1511_p6 }
  0xf7   : > { %1521 = shalt.err (!%p1518_p0)
}
  0xf8   : > { %s1672_s30 = smov 64   ;;  %s1673_s21 = smov 4  }
  0xf9   : > { %1165 = dma.hbm_to_vmem [thread:$0]  (!%p2293_p8), %s2050_s19, 2048, %s2052_s14, %s2056_s13, %s1672_s30, %s1672_s30, %s1673_s21  }
  0xfa   : > { %s2296_s20 = sld [smem:[#allocation29_spill]] }
 0x100   : > { %p2297_p12 = scmp.ne.s32.totalorder %s2296_s20, 0 }
 0x101   : > { %s2083_s5 = sand.u32 (!%p2297_p12), 1, %s1636_s28   ;;  %p2298_p3 = scmp.ne.s32.totalorder (!%p2297_p12), %s2283_s24, 0 }
 0x102   : > { %367 = sbr.rel (%p2297_p12) target bundleno = 1117 (0x45d), region = 48  ;;  %s1047_s15 = sshll.u32 (!%p2297_p12), %s2083_s5, 3 }
 0x103   : > { %s370_s10 = scalar_lea.sflag (!%p2297_p12), [#allocation5], %s2083_s5  ;;  %s2087_s0 = scalar_lea.vmem (!%p2297_p12), [#allocation4], %s1047_s15 }
 0x109   : > { %1595 = dma.done.wait (%p2298_p3), %s370_s10, 128  }
 0x10a   : > { %1597 = vsyncadd (%p2298_p3), %s370_s10, 4294967168  ;;  %p2299_p8 = scmp.eq.s32.totalorder %s1771_s12, 0 }
 0x10c   : > { %1599 = dma.done.wait (%p2299_p8), [#allocation8], 32   ;;  %p2300_p10 = pmov %p2299_p8 }
 0x10d   : > { %s2301_s23 = sld [smem:[#allocation23_spill]]  ;;  %s386_s19 = sand.u32 1, %s1771_s12  }
 0x10e   : > { %1601 = vsyncadd (%p2300_p10), [#allocation8], 4294967264  ;;  %s2302_s14 = sld [smem:[#allocation28_spill]]  ;;  %s387_s17 = scalar_lea.sflag [#allocation11], %s386_s19 }
 0x113   : > { %s388_s13 = sand.u32 1, %s2301_s23  }
 0x114   : > { %s1050_s22 = sshll.u32 %s388_s13, 7  ;;  %p2303_p1 = scmp.ne.s32.totalorder %s2302_s14, 0 }
 0x115   : > { %s2099_s25 = scalar_lea.vmem [#allocation10], %s1050_s22 }
 0x116   : > { %1603 = dma.done.wait (%p2303_p1), %s387_s17, 2080  }
 0x117   : > { %1605 = vsyncadd (%p2303_p1), %s387_s17, 4294965216  ;;  %s2105_s24 = sshll.u32 %s388_s13, 1  ;;  %s405_s7 = scalar_lea.sflag [#allocation14], %s386_s19 }
 0x118   : > { %s399_s2 = scalar_lea.vmem [#allocation12], %s2105_s24  ;;  %s2108_s6 = scalar_lea.vmem [#allocation13], %s1050_s22 }
 0x119   : > { %1607 = dma.done.wait (%p2303_p1), %s405_s7, 2048  }
 0x11a   : > { %1609 = vsyncadd (%p2303_p1), %s405_s7, 4294965248  ;;  %p2304_p13 = pmov %p2299_p8 }
 0x11b   : > { %p2305_p2 = pmov %p2299_p8 }
 0x11c   : > { %1611 = dma.done.wait (%p2304_p13), [#allocation14], 16  }
 0x11d   : > { %1613 = vsyncadd (%p2305_p2), [#allocation14], 4294967280  ;;  %s2118_s8 = scalar_lea.vmem [#allocation16], %s1047_s15  ;;  %s2306_s29 = sld [smem:[#allocation25_spill]] }
 0x123   : > { %p1055_p4 = scmp.ne.s32.totalorder %s2306_s29, 0 }
 0x124   : > { %v466_v0 = vld [vmem:[%s2087_s0] sm:$0xff] (!%p1055_p4)  ;;  %v1674_v5 = vmov (!%p1055_p4), 0.0   ;;  %v1056_v10 = vld [vmem:[#allocation7] ss:$0 sm:$0xff] (!%p1055_p4)  ;;  %v1057_v12 = vld [vmem:[#allocation9] ss:$0 sm:$0xff] (!%p1055_p4) }
 0x125   : > { %465 = sbr.rel (%p1055_p4) target bundleno = 607 (0x25f), region = 80  ;;  %467 = vadd.xlane.f32.xlu0 (!%p1055_p4), %v466_v0  ;;  %497 = vst [vmem:[#allocation3] sm:$0xff] (!%p1055_p4), %v1674_v5 }
 0x1b2   : > { %v468_v1 = vpop.xlane.xlu0 %467 }
 0x1b3   : > { %v470_v2 = vmul.f32 0.0078125, %v468_v1 }
 0x1b5   : > { %v471_v3 = vsub.f32 %v466_v0, %v470_v2 }
 0x1b7   : > { %v472_v4 = vmul.f32 %v471_v3, %v471_v3 }
 0x1b9   : > { %473 = vadd.xlane.f32.xlu0 %v472_v4 }
 0x246   : > { %v474_v6 = vpop.xlane.xlu0 %473 }
 0x247   : > { %v475_v7 = vmul.f32 0.0078125, %v474_v6 }
 0x249   : > { %v476_v8 = vadd.f32 1e-05, %v475_v7 }
 0x24b   : > { %1276 = vrsqrt.f32 %v476_v8 }
 0x255   : > { %v1277_v9 = vpop.eup %1276 }
 0x256   : > { %v478_v11 = vmul.f32 %v1277_v9, %v471_v3 }
 0x258   : > { %v486_v13 = vmul.f32 %v1056_v10, %v478_v11 }
 0x25a   : > { %v494_v14 = vadd.f32 %v1057_v12, %v486_v13 }
 0x25c   : > { %v495_v15 = vpack.c.bf16 %v494_v14, %v494_v14 }
 0x25e   : > { %496 = vst [vmem:[#allocation2] sm:$0xf] %v495_v15 }
 0x25f PF: > { %v1278_v16 = vld [vmem:[%s2099_s25 + $0x4] ss:$8 sps:$4 sm:$0xff]   ;;  %v1280_v17 = vld [vmem:[%s2099_s25] ss:$8 sps:$4 sm:$0xff]   ;;  %v1675_v18 = vmov 0   ;;  %v1306_v31 = vld [vmem:[%s2108_s6 + $0x50] sm:$0xff]   ;;  %v517_v50 = vlaneseq }
 0x260   : > { %639 = vmatprep.mubr.bf16.mxu0 %v1675_v18  ;;  %607 = vmatprep.subr.bf16.mxu0 %v1278_v16  ;;  %v1281_v19 = vld [vmem:[%s2099_s25 + $0x14] ss:$8 sps:$4 sm:$0xff]   ;;  %v1283_v20 = vld [vmem:[%s2099_s25 + $0x10] ss:$8 sps:$4 sm:$0xff]   ;;  %v1284_v21 = vld [vmem:[%s2099_s25 + $0x24] ss:$8 sps:$4 sm:$0xff]  }
 0x261   : > { %608 = vmatpush1.bf16.msra.mxu0 %v1280_v17  ;;  %v1286_v22 = vld [vmem:[%s2099_s25 + $0x20] ss:$8 sps:$4 sm:$0xff]   ;;  %v1287_v23 = vld [vmem:[%s2099_s25 + $0x34] ss:$8 sps:$4 sm:$0xff]   ;;  %v1289_v24 = vld [vmem:[%s2099_s25 + $0x30] ss:$8 sps:$4 sm:$0xff]  }
 0x262   : > { %609 = vmatprep.subr.bf16.mxu0 %v1281_v19  ;;  %v1290_v25 = vld [vmem:[%s2099_s25 + $0x44] ss:$8 sps:$4 sm:$0xff]   ;;  %v1292_v28 = vld [vmem:[%s2099_s25 + $0x40] ss:$8 sps:$4 sm:$0xff]   ;;  %v1293_v32 = vld [vmem:[%s2099_s25 + $0x54] ss:$8 sps:$4 sm:$0xff]  }
 0x263   : > { %v1302_v26 = vld [vmem:[%s2108_s6 + $0x40] sm:$0xff]   ;;  %v1304_v29 = vld [vmem:[%s2108_s6 + $0x48] sm:$0xff]   ;;  %v1307_v34 = vld [vmem:[%s2108_s6 + $0x10] sm:$0xff]   ;;  %v518_v51 = vshrl.u32 %v517_v50, 7  ;;  %s2307_s12 = sld [smem:[#allocation25_spill]] }
 0x264   : > { %v1303_v27 = vld [vmem:[%s2108_s6] sm:$0xff]   ;;  %1099 = vmatprep.subr.bf16.mxu1 %v1302_v26  ;;  %v1305_v30 = vld [vmem:[%s2108_s6 + $0x8] sm:$0xff]   ;;  %v1308_v35 = vld [vmem:[%s2108_s6 + $0x58] sm:$0xff]  }
 0x265   : > { %610 = vmatpush1.bf16.msra.mxu0 %v1283_v20  ;;  %1100 = vmatpush3.bf16.msra.mxu1 %v1303_v27  ;;  %v1295_v33 = vld [vmem:[%s2099_s25 + $0x50] ss:$8 sps:$4 sm:$0xff]   ;;  %v1296_v36 = vld [vmem:[%s2099_s25 + $0x64] ss:$8 sps:$4 sm:$0xff]   ;;  %v1298_v37 = vld [vmem:[%s2099_s25 + $0x60] ss:$8 sps:$4 sm:$0xff]  }
 0x266   : > { %611 = vmatprep.subr.bf16.mxu0 %v1284_v21  ;;  %1101 = vmatprep.subr.bf16.mxu1 %v1304_v29  ;;  %v1299_v38 = vld [vmem:[%s2099_s25 + $0x74] ss:$8 sps:$4 sm:$0xff]   ;;  %v1310_v40 = vld [vmem:[%s2108_s6 + $0x60] sm:$0xff]   ;;  %v1301_v42 = vld [vmem:[%s2099_s25 + $0x70] ss:$8 sps:$4 sm:$0xff]   ;;  %v519_v52 = vsub.s32 0, %v518_v51 }
 0x267   : > { %v1309_v39 = vld [vmem:[%s2108_s6 + $0x18] sm:$0xff]   ;;  %v1311_v41 = vld [vmem:[%s2108_s6 + $0x20] sm:$0xff]   ;;  %v1312_v43 = vld [vmem:[%s2108_s6 + $0x68] sm:$0xff]   ;;  %v523_v54 = vsub.s32 1, %v518_v51 }
 0x268   : > { %v1313_v44 = vld [vmem:[%s2108_s6 + $0x28] sm:$0xff]   ;;  %v498_v45 = vld [vmem:[#allocation2] sm:$0xf]  ;;  %v1314_v46 = vld [vmem:[%s2108_s6 + $0x70] sm:$0xff]  }
 0x269   : > { %612 = vmatpush1.bf16.msra.mxu0 %v1286_v22  ;;  %1102 = vmatpush3.bf16.msra.mxu1 %v1305_v30  ;;  %v1315_v47 = vld [vmem:[%s2108_s6 + $0x30] sm:$0xff]   ;;  %v1316_v48 = vld [vmem:[%s2108_s6 + $0x78] sm:$0xff]   ;;  %v652_v4 = vld [vmem:[#allocation3] sm:$0xff]  ;;  %p1090_p7 = scmp.ne.s32.totalorder %s2307_s12, 1 }
 0x26a   : > { %613 = vmatprep.subr.bf16.mxu0 %v1287_v23  ;;  %1103 = vmatprep.subr.bf16.mxu1 %v1306_v31  ;;  %v1317_v49 = vld [vmem:[%s2108_s6 + $0x38] sm:$0xff]   ;;  %v1091_v11 = vld [vmem:[#allocation15] ss:$0 sm:$0xff] (!%p1090_p7)  ;;  %v836_v12 = vld [vmem:[%s2087_s0] sm:$0xff] (!%p1090_p7) }
 0x26b   : > { %v515_v53 = vld [vmem:[%s399_s2] sm:$0x3] }
 0x26c   : > { %v520_v55 = vrot.slane %v515_v53, %v519_v52  ;;  %v524_v56 = vrot.slane %v515_v53, %v523_v54 }
 0x26d   : > { %614 = vmatpush1.bf16.msra.mxu0 %v1289_v24  ;;  %1104 = vmatpush3.bf16.msra.mxu1 %v1307_v34 }
 0x26e   : > { %615 = vmatprep.subr.bf16.mxu0 %v1290_v25  ;;  %1105 = vmatprep.subr.bf16.mxu1 %v1308_v35 }
 0x271   : > { %616 = vmatpush1.bf16.msra.mxu0 %v1292_v28  ;;  %1106 = vmatpush3.bf16.msra.mxu1 %v1309_v39 }
 0x272   : > { %617 = vmatprep.subr.bf16.mxu0 %v1293_v32  ;;  %1107 = vmatprep.subr.bf16.mxu1 %v1310_v40 }
 0x275   : > { %618 = vmatpush1.bf16.msra.mxu0 %v1295_v33  ;;  %1108 = vmatpush3.bf16.msra.mxu1 %v1311_v41 }
 0x276   : > { %619 = vmatprep.subr.bf16.mxu0 %v1296_v36  ;;  %1109 = vmatprep.subr.bf16.mxu1 %v1312_v43 }
 0x279   : > { %620 = vmatpush1.bf16.msra.mxu0 %v1298_v37  ;;  %1110 = vmatpush3.bf16.msra.mxu1 %v1313_v44 }
 0x27a   : > { %621 = vmatprep.subr.bf16.mxu0 %v1299_v38  ;;  %1111 = vmatprep.subr.bf16.mxu1 %v1314_v46 }
 0x27d   : > { %622 = vmatpush1.bf16.msra.mxu0 %v1301_v42  ;;  %1112 = vmatpush3.bf16.msra.mxu1 %v1315_v47 }
 0x27e   : > { %1113 = vmatprep.subr.bf16.mxu1 %v1316_v48 }
 0x280   : > { %640 = vmatmul.mubr.bf16.vlgmr.msra.gmra.mrb[0].mxu0 %v498_v45 }
 0x281   : > { %1114 = vmatpush3.bf16.msra.mxu1 %v1317_v49 }
 0x353   : > { %v641_v57 = vpop.f32.mrb[0].mxu0 }
 0x354   : > { %v642_v58 = vadd.f32 %v641_v57, %v520_v55  ;;  %v643_v59 = vpop.f32.mrb[1].mxu0 }
 0x355   : > { %v644_v60 = vadd.f32 %v643_v59, %v524_v56  ;;  %v645_v61 = vpop.f32.mrb[2].mxu0 }
 0x356   : > { %v648_v62 = vmax.f32 %v642_v58, 0.0  ;;  %v646_v63 = vpop.f32.mrb[3].mxu0 }
 0x357   : > { %v649_v0 = vmax.f32 %v644_v60, 0.0 }
 0x358   : > { %v650_v2 = vpack.c.bf16 %v648_v62, %v648_v62 }
 0x359   : > { %v651_v1 = vpack.c.bf16 %v649_v0, %v649_v0 }
 0x35b   : > { %813 = vmatprep.mubr.bf16.mxu1 %v651_v1 }
 0x35c   : > { %814 = vmatmul.mubr.bf16.vlgmr.msra.gmra.mrb[0].mxu1 %v650_v2 }
 0x42f   : > { %v1115_v3 = vpop.f32.mrb[0].mxu1  ;;  %826 = sbr.rel (%p1090_p7) target bundleno = 1090 (0x442), region = 84 }
 0x430   : > { %v1116_v5 = vpop.f32.mrb[1].mxu1 }
 0x431   : > { %v1117_v6 = vadd.f32 %v1116_v5, %v1115_v3  ;;  %v1118_v7 = vpop.f32.mrb[2].mxu1 }
 0x432   : > { %v1119_v8 = vpop.f32.mrb[3].mxu1 }
 0x433   : > { %v821_v9 = vadd.f32 %v1117_v6, %v652_v4 }
 0x435   : > { %822 = vst [vmem:[#allocation3] sm:$0xff] %v821_v9 }
 0x43c   : > { %v827_v10 = vld [vmem:[#allocation3] sm:$0xff] }
 0x43d   : > { %v835_v13 = vadd.f32 %v1091_v11, %v827_v10 }
 0x43f   : > { %v837_v14 = vadd.f32 %v836_v12, %v835_v13 }
 0x441   : > { %838 = vst [vmem:[%s2118_s8] sm:$0xff] %v837_v14 }
 0x442 PF: > { %s2308_s30 = sld [smem:[#allocation26_spill]]  ;;  %s853_s19 = sshll.u32 %s2118_s8, 4  ;;  %s854_s19 = int_to_ptr.vmem [resolvable:$true] %s853_s19 }
 0x443   : > { %s2309_s10 = sld [smem:[#allocation39_spill]]  ;;  %s840_s13 = scalar_lea.sflag [#allocation6], %s2083_s5 }
 0x444   : > { %s1522_s22 = scalar_lea.vmem %s854_s19, 128  ;;  %p2311_p5 = scmp.ne.s32.totalorder %s2286_s18, 0 }
 0x445   : > { %p1523_p6 = scmp.ne.s32.totalorder %s854_s19, %s1522_s22  ;;  %s1676_s0 = smov [#allocation16]  }
 0x446   : > { %s1526_s17 = sshll.u32 %s1676_s0, 4  ;;  %s1527_s17 = int_to_ptr.vmem [resolvable:$false] %s1526_s17 }
 0x447   : > { %p1524_p11 = pnand %p1523_p6, %p2311_p5  ;;  %s1528_s25 = scalar_lea.vmem %s1527_s17, 256 }
 0x448   : > { %s1093_s21 = sshll.u32 %s2308_s30, 7  ;;  %p1529_p0 = scmp.lt.s32.totalorder %s854_s19, %s1527_s17 }
 0x449   : > { %s2310_s23 = smov %s2309_s10  ;;  %s2163_s14 = scalar_lea.hbm %s2309_s10, %s1093_s21 }
 0x44a   : > { %p1525_p9 = pneg %p1524_p11  ;;  %p1530_p12 = scmp.lt.s32.totalorder %s1528_s25, %s1522_s22 }
 0x44c   : > { %p1531_p3 = por %p1530_p12, %p1529_p0 }
 0x44e   : > { %p1532_p8 = pnand %p1531_p3, %p1525_p9 }
 0x450   : > { %1535 = shalt.err (!%p1532_p8)
}
 0x451   : > { %s1536_s5 = scalar_lea.hbm %s2163_s14, 128  ;;  %s1540_s7 = scalar_lea.hbm %s2310_s23, 256 }
 0x452   : > { %p1537_p10 = scmp.ne.s32.totalorder %s2163_s14, %s1536_s5  ;;  %p1541_p2 = scmp.lt.u32.totalorder %s2163_s14, %s2310_s23 }
 0x453   : > { %p1542_p4 = scmp.lt.u32.totalorder %s1540_s7, %s1536_s5  ;;  %p1544_p6 = scmp.lt.u32.totalorder %s1536_s5, %s2163_s14 }
 0x454   : > { %p1538_p1 = pnand %p1537_p10, %p2311_p5 }
 0x455   : > { %p1543_p7 = por %p1542_p4, %p1541_p2 }
 0x456   : > { %p1539_p13 = pneg %p1538_p1 }
 0x457   : > { %p1545_p11 = por %p1544_p6, %p1543_p7 }
 0x459   : > { %p1546_p9 = pnand %p1545_p11, %p1539_p13 }
 0x45b   : > { %1549 = shalt.err (!%p1546_p9)
}
 0x45c   : > { %1141 = dma.vmem_to_hbm [thread:$0]  (%p2311_p5), %s854_s19, 128, %s2163_s14, %s840_s13  }
 0x45d PF: > { %p1177_p0 = scmp.ge.s32.totalorder %s1660_s11, 2  ;;  %s865_s29 = sand.u32 1, %s1632_s27  }
 0x45e   : > { %p2312_p12 = scmp.ne.s32.totalorder %s2288_s3, 0  ;;  %s866_s12 = scalar_lea.sflag [#allocation6], %s865_s29 }
 0x460   : > { %p1167_p3 = pnand %p1177_p0, %p2312_p12 }
 0x462   : > { %1615 = dma.done.wait (!%p1167_p3), %s866_s12, 128  }
 0x463   : > { %1617 = vsyncadd (!%p1167_p3), %s866_s12, 4294967168  ;;  %s30_s11 = sadd.s32 1, %s1660_s11   ;;  %s2313_s24 = sld [smem:[#allocation23_spill]] }
 0x464   : > { %p27_p8 = scmp.ge.s32.totalorder %s30_s11, 6   ;;  %s2314_s18 = sld [smem:[#allocation24_spill]] }
 0x465   : > { %s2315_s29 = sld [smem:[#allocation32_spill]]  ;;  %s2316_s8 = sld [smem:[#allocation27_spill]] }
 0x466   : > { %s2317_s21 = sld [smem:[#allocation30_spill]]  ;;  %s2318_s10 = sld [smem:[#allocation31_spill]] }
 0x467   : > { %s2319_s25 = smov %s1628_s26  ;;  %s2320_s26 = smov %s1959_s16 }
 0x468   : > { %s2321_s27 = smov %s1636_s28  ;;  %s2323_s30 = smov %s1652_s9 }
 0x469   :  { %29 = sbr.rel (!%p27_p8) target bundleno = 22 (0x16), region = 150 }
 0x46a   : > { %s2322_s28 = smov %s2314_s18 }
 0x46c   : > { %s2324_s9 = smov %s2317_s21 }
 0x470   :  { %871 = vsyncpa [#allocation5], 1 }
 0x471   :  { %873 = vsyncpa [#allocation5 + $0x1], 1 }
 0x472   :  { %874 = vsyncpa [#allocation8], 1 }
 0x473   :  { %875 = vsyncpa [#allocation11], 1 }
 0x474   :  { %877 = vsyncpa [#allocation11 + $0x1], 1 }
 0x475   :  { %878 = vsyncpa [#allocation14], 1 }
 0x476   :  { %880 = vsyncpa [#allocation14 + $0x1], 1 }
 0x477   :  { %881 = vsyncpa [#allocation6], 1 }
 0x478   :  { %883 = vsyncpa [#allocation6 + $0x1], 1 }

</bundles_post_ra>
